<compile_context>
chip_gen: v7x
topology: tpu7x:2x2x1
jax: 0.10.0
libtpu: 0.0.40
codegen_flags: <defaults>
</compile_context>

<pallas_src>
import functools
import math

import jax
import jax.numpy as jnp
import numpy as np
from jax import lax
from jax.experimental import pallas as pl
from jax.experimental.pallas import tpu as pltpu

_NEG_INF = -1e30
_LN_EPS = 1e-5


# ----------------------------------------------------------------------------
# Pallas kernel: one encoder layer, one (batch, query-tile) grid step.
# ----------------------------------------------------------------------------
def _encoder_layer_kernel(xfull_ref, kbias_ref,
                          wq_ref, bq_ref, wkv_ref, bkv_ref,
                          wo_ref, bo_ref, w1_ref, b1_ref, w2_ref, b2_ref,
                          g1_ref, be1_ref, g2_ref, be2_ref,
                          out_ref, kv_sc, ctx_sc, *, nhead):
    S = xfull_ref.shape[1]
    D = xfull_ref.shape[2]
    TQ = out_ref.shape[1]
    hd = D // nhead
    qi = pl.program_id(1)

    # ---- K / V projection for the full sequence: one fused full-width
    #      matmul, computed once per batch element (query tile 0), kept
    #      resident in a lane-dense [S, 2D] bf16 VMEM scratch. ---------------
    @pl.when(qi == 0)
    def _():
        x_full_bf = xfull_ref[0].astype(jnp.bfloat16)             # [S, D]
        kv = jnp.dot(x_full_bf, wkv_ref[...],
                     preferred_element_type=jnp.float32) + bkv_ref[...]
        kv_sc[...] = kv.astype(jnp.bfloat16)                      # [S, 2D]

    # ---- query tile: read from the resident full-sequence block (no second
    #      HBM input stream). -------------------------------------------------
    q0 = pl.multiple_of(qi * TQ, TQ)
    xq = xfull_ref[0, pl.ds(q0, TQ), :]                           # [TQ, D] f32
    xq_bf = xq.astype(jnp.bfloat16)

    # ---- additive attention bias: causal + key padding, built in-kernel ----
    row = qi * TQ + lax.broadcasted_iota(jnp.int32, (TQ, S), 0)
    col = lax.broadcasted_iota(jnp.int32, (TQ, S), 1)
    bias = jnp.where(col > row, _NEG_INF, 0.0).astype(jnp.float32) \
        + kbias_ref[0]                                            # [TQ, S]

    # ---- fused Q projection (1/sqrt(hd) already folded into wq / bq) --------
    q_all = jnp.dot(xq_bf, wq_ref[...],
                    preferred_element_type=jnp.float32) + bq_ref[...]
    q_all = q_all.astype(jnp.bfloat16)                            # [TQ, D]

    # ---- per-head attention; context written head-concatenated into a
    #      [TQ, D] scratch so W_o runs as a single full-K matmul. ------------
    for h in range(nhead):                                        # static loop
        qh = q_all[:, h * hd:(h + 1) * hd]                        # [TQ, hd]
        kh = kv_sc[:, h * hd:(h + 1) * hd]                        # [S, hd]
        vh = kv_sc[:, D + h * hd:D + (h + 1) * hd]                # [S, hd]
        sc = lax.dot_general(qh, kh, (((1,), (1,)), ((), ())),
                             preferred_element_type=jnp.float32)  # [TQ, S]
        sc = sc + bias
        sc = sc - jnp.max(sc, axis=-1, keepdims=True)
        p = jnp.exp(sc)
        p = p * pl.reciprocal(jnp.sum(p, axis=-1, keepdims=True), approx=True)
        ctx = jnp.dot(p.astype(jnp.bfloat16), vh,
                      preferred_element_type=jnp.float32)         # [TQ, hd]
        ctx_sc[:, h * hd:(h + 1) * hd] = ctx.astype(jnp.bfloat16)

    attn = jnp.dot(ctx_sc[...], wo_ref[...],
                   preferred_element_type=jnp.float32) + bo_ref[...]

    def _ln(z, g, b):
        mu = jnp.mean(z, axis=-1, keepdims=True)
        zc = z - mu
        var = jnp.mean(zc * zc, axis=-1, keepdims=True)
        return zc * lax.rsqrt(var + _LN_EPS) * g + b

    # ---- residual + LayerNorm 1 ---------------------------------------------
    x1 = _ln(xq + attn, g1_ref[...], be1_ref[...])

    # ---- feed-forward --------------------------------------------------------
    h1 = jnp.dot(x1.astype(jnp.bfloat16), w1_ref[...],
                 preferred_element_type=jnp.float32) + b1_ref[...]
    h1 = jnp.maximum(h1, 0.0)
    y = jnp.dot(h1.astype(jnp.bfloat16), w2_ref[...],
                preferred_element_type=jnp.float32) + b2_ref[...]

    # ---- residual + LayerNorm 2 ---------------------------------------------
    out_ref[0] = _ln(x1 + y, g2_ref[...], be2_ref[...])


# ----------------------------------------------------------------------------
# pallas_call wrapper for one encoder layer
# ----------------------------------------------------------------------------
def _const_spec(arr):
    nd = arr.ndim
    return pl.BlockSpec(arr.shape, lambda b, q, _n=nd: (0,) * _n)


def _pick_tq(S):
    for t in (512, 256, 128):
        if S % t == 0:
            return t
    return S


def _vmem_limit_bytes(B, S, D, F, tq):
    f32, bf = 4, 2
    act = 2 * (S * D) * f32 + 2 * S * f32 + 2 * (tq * D) * f32
    w = (D * D + D * 2 * D + D * D + D * F + F * D) * bf
    w += (D + 2 * D + D + F + D + 4 * D) * f32
    scr = (S * 2 * D + tq * D) * bf
    est = act + 2 * w + scr          # weights double-buffered by default
    return int(min(100 * 2**20, max(32 * 2**20, 1.5 * est)))


def encoder_layer_pallas(x, kbias, weight_args, nhead, tq):
    B, S, D = x.shape
    F = weight_args[6].shape[1]      # w1: [D, F]
    nq = S // tq

    in_specs = [
        pl.BlockSpec((1, S, D), lambda b, q: (b, 0, 0)),    # full seq (KV + q)
        pl.BlockSpec((1, 1, S), lambda b, q: (b, 0, 0)),    # key-padding bias
    ] + [_const_spec(w) for w in weight_args]

    kernel = functools.partial(_encoder_layer_kernel, nhead=nhead)

    call = pl.pallas_call(
        kernel,
        out_shape=jax.ShapeDtypeStruct((B, S, D), jnp.float32),
        grid_spec=pltpu.PrefetchScalarGridSpec(
            num_scalar_prefetch=0,
            grid=(B, nq),
            in_specs=in_specs,
            out_specs=pl.BlockSpec((1, tq, D), lambda b, q: (b, q, 0)),
            scratch_shapes=[pltpu.VMEM((S, 2 * D), jnp.bfloat16),   # K|V
                            pltpu.VMEM((tq, D), jnp.bfloat16)],     # ctx
        ),
        compiler_params=pltpu.CompilerParams(
            dimension_semantics=("parallel", "arbitrary"),
            vmem_limit_bytes=_vmem_limit_bytes(B, S, D, F, tq)),
    )
    return call(x, kbias, *weight_args)


# ----------------------------------------------------------------------------
# Parameter preparation (done ONCE at model setup, not per forward call):
# bf16 cast, 1/sqrt(hd) folding into W_q/b_q, K/V weight fusion.
# ----------------------------------------------------------------------------
def prep_layer_args(p, nhead):
    D = p["wq"].shape[0]
    F = p["w1"].shape[1]
    hd = D // nhead
    scale = 1.0 / math.sqrt(hd)
    bf = jnp.bfloat16

    wkv = jnp.concatenate([p["wk"], p["wv"]], axis=1)          # [D, 2D]
    bkv = jnp.concatenate([p["bk"], p["bv"]]).reshape(1, 2 * D)

    return (
        (p["wq"] * scale).astype(bf), (p["bq"] * scale).reshape(1, D),
        wkv.astype(bf),               bkv,
        p["wo"].astype(bf),           p["bo"].reshape(1, D),
        p["w1"].astype(bf),           p["b1"].reshape(1, F),
        p["w2"].astype(bf),           p["b2"].reshape(1, D),
        p["g1"].reshape(1, D), p["be1"].reshape(1, D),
        p["g2"].reshape(1, D), p["be2"].reshape(1, D),
    )


def prepare_params(layer_params, nhead):
    return [prep_layer_args(p, nhead) for p in layer_params]


# ----------------------------------------------------------------------------
# Transformer (encoder-only) wrapper, mirroring Transformer.forward
# ----------------------------------------------------------------------------
def transformer_forward(src, src_length_mask, prepped_layer_args, nhead):
    """src: [B, S, D] float32; src_length_mask: [B, S] bool (True == pad)."""
    B, S, D = src.shape
    # Only the O(B*S) padding vector goes to the kernel; the causal part is
    # built in-kernel with iota.
    kbias = jnp.where(src_length_mask[:, None, :], _NEG_INF, 0.0
                      ).astype(jnp.float32)                      # [B, 1, S]
    tq = _pick_tq(S)
    assert S % tq == 0, "sequence length must be divisible by the query tile"

    x = src
    for args in prepped_layer_args:
        x = encoder_layer_pallas(x, kbias, args, nhead, tq)
    attachment_logits_all = []   # depth_embed is None -> no attachment logits
    return x, attachment_logits_all


# ----------------------------------------------------------------------------
# Pure-JAX f32 reference (true module semantics) for correctness check
# ----------------------------------------------------------------------------
def _reference_layer(x, attn_bias, p, nhead):
    B, S, D = x.shape
    hd = D // nhead
    q = x @ p["wq"] + p["bq"]
    k = x @ p["wk"] + p["bk"]
    v = x @ p["wv"] + p["bv"]
    q = q.reshape(B, S, nhead, hd).transpose(0, 2, 1, 3)
    k = k.reshape(B, S, nhead, hd).transpose(0, 2, 1, 3)
    v = v.reshape(B, S, nhead, hd).transpose(0, 2, 1, 3)
    sc = jnp.einsum("bhid,bhjd->bhij", q, k) / math.sqrt(hd)
    sc = sc + attn_bias[:, None, :, :]
    pr = jax.nn.softmax(sc, axis=-1)
    a = jnp.einsum("bhij,bhjd->bhid", pr, v).transpose(0, 2, 1, 3).reshape(B, S, D)
    a = a @ p["wo"] + p["bo"]

    def ln(z, g, b):
        mu = z.mean(-1, keepdims=True)
        var = ((z - mu) ** 2).mean(-1, keepdims=True)
        return (z - mu) / jnp.sqrt(var + _LN_EPS) * g + b

    x = ln(x + a, p["g1"], p["be1"])
    y = jnp.maximum(x @ p["w1"] + p["b1"], 0.0) @ p["w2"] + p["b2"]
    return ln(x + y, p["g2"], p["be2"])


def _reference_forward(src, src_length_mask, layer_params, nhead):
    B, S, D = src.shape
    pos_mask = jnp.triu(jnp.ones((S, S), dtype=bool), k=1)
    combined = pos_mask[None, :, :] | src_length_mask[:, None, :]
    attn_bias = jnp.where(combined, _NEG_INF, 0.0).astype(jnp.float32)
    x = src
    for p in layer_params:
        x = _reference_layer(x, attn_bias, p, nhead)
    return x


# ----------------------------------------------------------------------------
# Deterministic parameter init
# ----------------------------------------------------------------------------
def init_layer_params(key, d_model, dim_feedforward):
    ks = jax.random.split(key, 12)
    relu_gain = math.sqrt(2.0)

    def lin(k, fi, fo, gain=1.0):
        limit = gain * math.sqrt(6.0 / (fi + fo))
        return jax.random.uniform(k, (fi, fo), jnp.float32,
                                  minval=-limit, maxval=limit)

    def bias(k, n, scale=0.1):
        return scale * jax.random.normal(k, (n,), jnp.float32)

    return {
        "wq": lin(ks[0], d_model, d_model), "bq": bias(ks[1], d_model),
        "wk": lin(ks[2], d_model, d_model), "bk": bias(ks[3], d_model),
        "wv": lin(ks[4], d_model, d_model), "bv": bias(ks[5], d_model),
        "wo": lin(ks[6], d_model, d_model), "bo": bias(ks[7], d_model),
        "w1": lin(ks[8], d_model, dim_feedforward, relu_gain),
        "b1": bias(ks[9], dim_feedforward),
        "w2": lin(ks[10], dim_feedforward, d_model), "b2": bias(ks[11], d_model),
        "g1": jnp.ones((d_model,), jnp.float32),
        "be1": jnp.zeros((d_model,), jnp.float32),
        "g2": jnp.ones((d_model,), jnp.float32),
        "be2": jnp.zeros((d_model,), jnp.float32),
    }


# ----------------------------------------------------------------------------
if __name__ == "__main__":
    B, S = 2, 8
    d_model, nhead, dim_feedforward, n_layers = 32, 4, 64, 2

    root = jax.random.PRNGKey(0)
    k_src, k_params = jax.random.split(root)
    src = jax.random.normal(k_src, (B, S, d_model), jnp.float32)

    # src_length_mask: True == padding.  Batch 1 has its last 2 tokens padded.
    src_length_mask = jnp.array(
        [[False] * S,
         [False] * (S - 2) + [True, True]], dtype=bool)

    layer_keys = jax.random.split(k_params, n_layers)
    layer_params = [init_layer_params(k, d_model, dim_feedforward)
                    for k in layer_keys]

    # Weight prep (bf16 cast / fusion / scale folding) is done once here,
    # outside the forward pass.
    prepped = prepare_params(layer_params, nhead)

    out, attachment_logits_all = transformer_forward(
        src, src_length_mask, prepped, nhead)
    out = jax.block_until_ready(out)

    ref = _reference_forward(src, src_length_mask, layer_params, nhead)
    # Tolerance accounts for bf16 MXU matmuls (f32 accumulation) vs f32 ref.
    np.testing.assert_allclose(np.asarray(out), np.asarray(ref),
                               rtol=5e-2, atol=5e-2)
    assert attachment_logits_all == []

    print("KERNEL_OK")
</pallas_src>

<mosaic_0001>
module attributes {stable_mosaic.version = 11 : i64} {
  func.func @_encoder_layer_kernel(%arg0: i32, %arg1: i32, %arg2: memref<1x8x32xf32, #tpu.memory_space<vmem>>, %arg3: memref<1x1x8xf32, #tpu.memory_space<vmem>>, %arg4: memref<32x32xbf16, #tpu.memory_space<vmem>>, %arg5: memref<1x32xf32, #tpu.memory_space<vmem>>, %arg6: memref<32x64xbf16, #tpu.memory_space<vmem>>, %arg7: memref<1x64xf32, #tpu.memory_space<vmem>>, %arg8: memref<32x32xbf16, #tpu.memory_space<vmem>>, %arg9: memref<1x32xf32, #tpu.memory_space<vmem>>, %arg10: memref<32x64xbf16, #tpu.memory_space<vmem>>, %arg11: memref<1x64xf32, #tpu.memory_space<vmem>>, %arg12: memref<64x32xbf16, #tpu.memory_space<vmem>>, %arg13: memref<1x32xf32, #tpu.memory_space<vmem>>, %arg14: memref<1x32xf32, #tpu.memory_space<vmem>>, %arg15: memref<1x32xf32, #tpu.memory_space<vmem>>, %arg16: memref<1x32xf32, #tpu.memory_space<vmem>>, %arg17: memref<1x32xf32, #tpu.memory_space<vmem>>, %arg18: memref<1x8x32xf32, #tpu.memory_space<vmem>>, %arg19: memref<8x64xbf16, #tpu.memory_space<vmem>>, %arg20: memref<8x32xbf16, #tpu.memory_space<vmem>>) attributes {dimension_semantics = [#tpu.dimension_semantics<parallel>, #tpu.dimension_semantics<arbitrary>], iteration_bounds = array<i64: 2, 1>, scalar_prefetch = 0 : i64, scratch_operands = 2 : i64, tpu.core_type = #tpu.core_type<tc>, window_params = [{transform_indices = @transform_0, window_bounds = array<i64: 1, 8, 32>}, {transform_indices = @transform_1, window_bounds = array<i64: 1, 1, 8>}, {pipeline_mode = #tpu.pipeline_mode<synchronous>, transform_indices = @transform_2, window_bounds = array<i64: 32, 32>}, {pipeline_mode = #tpu.pipeline_mode<synchronous>, transform_indices = @transform_3, window_bounds = array<i64: 1, 32>}, {pipeline_mode = #tpu.pipeline_mode<synchronous>, transform_indices = @transform_4, window_bounds = array<i64: 32, 64>}, {pipeline_mode = #tpu.pipeline_mode<synchronous>, transform_indices = @transform_5, window_bounds = array<i64: 1, 64>}, {pipeline_mode = #tpu.pipeline_mode<synchronous>, transform_indices = @transform_6, window_bounds = array<i64: 32, 32>}, {pipeline_mode = #tpu.pipeline_mode<synchronous>, transform_indices = @transform_7, window_bounds = array<i64: 1, 32>}, {pipeline_mode = #tpu.pipeline_mode<synchronous>, transform_indices = @transform_8, window_bounds = array<i64: 32, 64>}, {pipeline_mode = #tpu.pipeline_mode<synchronous>, transform_indices = @transform_9, window_bounds = array<i64: 1, 64>}, {pipeline_mode = #tpu.pipeline_mode<synchronous>, transform_indices = @transform_10, window_bounds = array<i64: 64, 32>}, {pipeline_mode = #tpu.pipeline_mode<synchronous>, transform_indices = @transform_11, window_bounds = array<i64: 1, 32>}, {pipeline_mode = #tpu.pipeline_mode<synchronous>, transform_indices = @transform_12, window_bounds = array<i64: 1, 32>}, {pipeline_mode = #tpu.pipeline_mode<synchronous>, transform_indices = @transform_13, window_bounds = array<i64: 1, 32>}, {pipeline_mode = #tpu.pipeline_mode<synchronous>, transform_indices = @transform_14, window_bounds = array<i64: 1, 32>}, {pipeline_mode = #tpu.pipeline_mode<synchronous>, transform_indices = @transform_15, window_bounds = array<i64: 1, 32>}, {transform_indices = @transform_16, window_bounds = array<i64: 1, 8, 32>}]} {
    %c0_i32 = arith.constant 0 : i32
    %0 = arith.cmpi eq, %arg1, %c0_i32 : i32
    %1 = arith.extui %0 : i1 to i32
    %c0_i32_0 = arith.constant 0 : i32
    %2 = arith.cmpi ne, %1, %c0_i32_0 : i32
    scf.if %2 {
      %c0_84 = arith.constant 0 : index
      %c0_85 = arith.constant 0 : index
      %c0_86 = arith.constant 0 : index
      %173 = vector.load %arg2[%c0_84, %c0_85, %c0_86] : memref<1x8x32xf32, #tpu.memory_space<vmem>>, vector<1x8x32xf32>
      %174 = vector.shape_cast %173 : vector<1x8x32xf32> to vector<8x32xf32>
      %175 = arith.truncf %174 : vector<8x32xf32> to vector<8x32xbf16>
      %c0_87 = arith.constant 0 : index
      %c0_88 = arith.constant 0 : index
      %176 = vector.load %arg6[%c0_87, %c0_88] : memref<32x64xbf16, #tpu.memory_space<vmem>>, vector<32x64xbf16>
      %cst_89 = arith.constant dense<0.000000e+00> : vector<8x64xf32>
      %177 = tpu.matmul %175, %176, %cst_89 {dimension_numbers = #tpu.dot_dimension_numbers<[1], [0], [0], [1], [0, 0, 1, 1], [], []>} : vector<8x32xbf16>, vector<32x64xbf16>, vector<8x64xf32> -> vector<8x64xf32>
      %c0_90 = arith.constant 0 : index
      %c0_91 = arith.constant 0 : index
      %178 = vector.load %arg7[%c0_90, %c0_91] : memref<1x64xf32, #tpu.memory_space<vmem>>, vector<1x64xf32>
      %179 = vector.broadcast %178 : vector<1x64xf32> to vector<8x64xf32>
      %180 = arith.addf %177, %179 : vector<8x64xf32>
      %181 = arith.truncf %180 : vector<8x64xf32> to vector<8x64xbf16>
      %c0_92 = arith.constant 0 : index
      %c0_93 = arith.constant 0 : index
      %182 = vector.load %arg19[%c0_92, %c0_93] : memref<8x64xbf16, #tpu.memory_space<vmem>>, vector<8x64xbf16>
      tpu.vector_store %arg19[%c0_92, %c0_93], %181 {strides = array<i32>} : memref<8x64xbf16, #tpu.memory_space<vmem>>, vector<8x64xbf16>,
    } else {
    }
    %c8_i32 = arith.constant 8 : i32
    %3 = arith.muli %arg1, %c8_i32 : i32
    %4 = tpu.assume_multiple %3, 8 : i32
    %c0 = arith.constant 0 : index
    %5 = arith.index_cast %4 : i32 to index
    %c0_1 = arith.constant 0 : index
    %6 = vector.load %arg2[%c0, %5, %c0_1] : memref<1x8x32xf32, #tpu.memory_space<vmem>>, vector<1x8x32xf32>
    %7 = vector.shape_cast %6 : vector<1x8x32xf32> to vector<8x32xf32>
    %8 = arith.truncf %7 : vector<8x32xf32> to vector<8x32xbf16>
    %c8_i32_2 = arith.constant 8 : i32
    %9 = arith.muli %arg1, %c8_i32_2 : i32
    %10 = tpu.iota {dimensions = array<i32: 0>} : vector<8x8xi32>
    %11 = vector.broadcast %9 : i32 to vector<8x8xi32>
    %12 = arith.addi %11, %10 : vector<8x8xi32>
    %13 = tpu.iota {dimensions = array<i32: 1>} : vector<8x8xi32>
    %14 = arith.cmpi sgt, %13, %12 : vector<8x8xi32>
    %cst = arith.constant -1.000000e+30 : f32
    %cst_3 = arith.constant 0.000000e+00 : f32
    %15 = vector.broadcast %cst : f32 to vector<8x8xf32>
    %16 = vector.broadcast %cst_3 : f32 to vector<8x8xf32>
    %17 = arith.select %14, %15, %16 : vector<8x8xi1>, vector<8x8xf32>
    %c0_4 = arith.constant 0 : index
    %c0_5 = arith.constant 0 : index
    %c0_6 = arith.constant 0 : index
    %18 = vector.load %arg3[%c0_4, %c0_5, %c0_6] : memref<1x1x8xf32, #tpu.memory_space<vmem>>, vector<1x1x8xf32>
    %19 = vector.shape_cast %18 : vector<1x1x8xf32> to vector<1x8xf32>
    %20 = vector.broadcast %19 : vector<1x8xf32> to vector<8x8xf32>
    %21 = arith.addf %17, %20 : vector<8x8xf32>
    %c0_7 = arith.constant 0 : index
    %c0_8 = arith.constant 0 : index
    %22 = vector.load %arg4[%c0_7, %c0_8] : memref<32x32xbf16, #tpu.memory_space<vmem>>, vector<32x32xbf16>
    %cst_9 = arith.constant dense<0.000000e+00> : vector<8x32xf32>
    %23 = tpu.matmul %8, %22, %cst_9 {dimension_numbers = #tpu.dot_dimension_numbers<[1], [0], [0], [1], [0, 0, 1, 1], [], []>} : vector<8x32xbf16>, vector<32x32xbf16>, vector<8x32xf32> -> vector<8x32xf32>
    %c0_10 = arith.constant 0 : index
    %c0_11 = arith.constant 0 : index
    %24 = vector.load %arg5[%c0_10, %c0_11] : memref<1x32xf32, #tpu.memory_space<vmem>>, vector<1x32xf32>
    %25 = vector.broadcast %24 : vector<1x32xf32> to vector<8x32xf32>
    %26 = arith.addf %23, %25 : vector<8x32xf32>
    %27 = arith.truncf %26 : vector<8x32xf32> to vector<8x32xbf16>
    %28 = vector.extract_strided_slice %27 {offsets = [0, 0], sizes = [8, 8], strides = [1, 1]} : vector<8x32xbf16> to vector<8x8xbf16>
    %c0_12 = arith.constant 0 : index
    %c0_13 = arith.constant 0 : index
    %29 = vector.load %arg19[%c0_12, %c0_13] : memref<8x64xbf16, #tpu.memory_space<vmem>>, vector<8x8xbf16>
    %c0_14 = arith.constant 0 : index
    %c32 = arith.constant 32 : index
    %30 = vector.load %arg19[%c0_14, %c32] : memref<8x64xbf16, #tpu.memory_space<vmem>>, vector<8x8xbf16>
    %cst_15 = arith.constant dense<0.000000e+00> : vector<8x8xf32>
    %31 = tpu.matmul %28, %29, %cst_15 {dimension_numbers = #tpu.dot_dimension_numbers<[1], [1], [0], [0], [0, 0, 1, 0], [], []>} : vector<8x8xbf16>, vector<8x8xbf16>, vector<8x8xf32> -> vector<8x8xf32>
    %32 = arith.addf %31, %21 : vector<8x8xf32>
    %cst_16 = arith.constant dense<0xFF800000> : vector<8xf32>
    %33 = vector.multi_reduction <maximumf>, %32, %cst_16 [1] : vector<8x8xf32> to vector<8xf32>
    %34 = vector.shape_cast %33 : vector<8xf32> to vector<8x1xf32>
    %35 = vector.broadcast %34 : vector<8x1xf32> to vector<8x8xf32>
    %36 = arith.subf %32, %35 : vector<8x8xf32>
    %37 = math.exp %36 : vector<8x8xf32>
    %cst_17 = arith.constant dense<0.000000e+00> : vector<8xf32>
    %38 = vector.multi_reduction <add>, %37, %cst_17 [1] : vector<8x8xf32> to vector<8xf32>
    %39 = vector.shape_cast %38 : vector<8xf32> to vector<8x1xf32>
    %40 = tpu.reciprocal %39 {approx = true} : vector<8x1xf32> -> vector<8x1xf32>
    %41 = vector.broadcast %40 : vector<8x1xf32> to vector<8x8xf32>
    %42 = arith.mulf %37, %41 : vector<8x8xf32>
    %43 = arith.truncf %42 : vector<8x8xf32> to vector<8x8xbf16>
    %cst_18 = arith.constant dense<0.000000e+00> : vector<8x8xf32>
    %44 = tpu.matmul %43, %30, %cst_18 {dimension_numbers = #tpu.dot_dimension_numbers<[1], [0], [0], [1], [0, 0, 1, 1], [], []>} : vector<8x8xbf16>, vector<8x8xbf16>, vector<8x8xf32> -> vector<8x8xf32>
    %45 = arith.truncf %44 : vector<8x8xf32> to vector<8x8xbf16>
    %c0_19 = arith.constant 0 : index
    %c0_20 = arith.constant 0 : index
    %46 = vector.load %arg20[%c0_19, %c0_20] : memref<8x32xbf16, #tpu.memory_space<vmem>>, vector<8x8xbf16>
    tpu.vector_store %arg20[%c0_19, %c0_20], %45 {strides = array<i32>} : memref<8x32xbf16, #tpu.memory_space<vmem>>, vector<8x8xbf16>,
    %47 = vector.extract_strided_slice %27 {offsets = [0, 8], sizes = [8, 8], strides = [1, 1]} : vector<8x32xbf16> to vector<8x8xbf16>
    %c0_21 = arith.constant 0 : index
    %c8 = arith.constant 8 : index
    %48 = vector.load %arg19[%c0_21, %c8] : memref<8x64xbf16, #tpu.memory_space<vmem>>, vector<8x8xbf16>
    %c0_22 = arith.constant 0 : index
    %c40 = arith.constant 40 : index
    %49 = vector.load %arg19[%c0_22, %c40] : memref<8x64xbf16, #tpu.memory_space<vmem>>, vector<8x8xbf16>
    %cst_23 = arith.constant dense<0.000000e+00> : vector<8x8xf32>
    %50 = tpu.matmul %47, %48, %cst_23 {dimension_numbers = #tpu.dot_dimension_numbers<[1], [1], [0], [0], [0, 0, 1, 0], [], []>} : vector<8x8xbf16>, vector<8x8xbf16>, vector<8x8xf32> -> vector<8x8xf32>
    %51 = arith.addf %50, %21 : vector<8x8xf32>
    %cst_24 = arith.constant dense<0xFF800000> : vector<8xf32>
    %52 = vector.multi_reduction <maximumf>, %51, %cst_24 [1] : vector<8x8xf32> to vector<8xf32>
    %53 = vector.shape_cast %52 : vector<8xf32> to vector<8x1xf32>
    %54 = vector.broadcast %53 : vector<8x1xf32> to vector<8x8xf32>
    %55 = arith.subf %51, %54 : vector<8x8xf32>
    %56 = math.exp %55 : vector<8x8xf32>
    %cst_25 = arith.constant dense<0.000000e+00> : vector<8xf32>
    %57 = vector.multi_reduction <add>, %56, %cst_25 [1] : vector<8x8xf32> to vector<8xf32>
    %58 = vector.shape_cast %57 : vector<8xf32> to vector<8x1xf32>
    %59 = tpu.reciprocal %58 {approx = true} : vector<8x1xf32> -> vector<8x1xf32>
    %60 = vector.broadcast %59 : vector<8x1xf32> to vector<8x8xf32>
    %61 = arith.mulf %56, %60 : vector<8x8xf32>
    %62 = arith.truncf %61 : vector<8x8xf32> to vector<8x8xbf16>
    %cst_26 = arith.constant dense<0.000000e+00> : vector<8x8xf32>
    %63 = tpu.matmul %62, %49, %cst_26 {dimension_numbers = #tpu.dot_dimension_numbers<[1], [0], [0], [1], [0, 0, 1, 1], [], []>} : vector<8x8xbf16>, vector<8x8xbf16>, vector<8x8xf32> -> vector<8x8xf32>
    %64 = arith.truncf %63 : vector<8x8xf32> to vector<8x8xbf16>
    %c0_27 = arith.constant 0 : index
    %c8_28 = arith.constant 8 : index
    %65 = vector.load %arg20[%c0_27, %c8_28] : memref<8x32xbf16, #tpu.memory_space<vmem>>, vector<8x8xbf16>
    tpu.vector_store %arg20[%c0_27, %c8_28], %64 {strides = array<i32>} : memref<8x32xbf16, #tpu.memory_space<vmem>>, vector<8x8xbf16>,
    %66 = vector.extract_strided_slice %27 {offsets = [0, 16], sizes = [8, 8], strides = [1, 1]} : vector<8x32xbf16> to vector<8x8xbf16>
    %c0_29 = arith.constant 0 : index
    %c16 = arith.constant 16 : index
    %67 = vector.load %arg19[%c0_29, %c16] : memref<8x64xbf16, #tpu.memory_space<vmem>>, vector<8x8xbf16>
    %c0_30 = arith.constant 0 : index
    %c48 = arith.constant 48 : index
    %68 = vector.load %arg19[%c0_30, %c48] : memref<8x64xbf16, #tpu.memory_space<vmem>>, vector<8x8xbf16>
    %cst_31 = arith.constant dense<0.000000e+00> : vector<8x8xf32>
    %69 = tpu.matmul %66, %67, %cst_31 {dimension_numbers = #tpu.dot_dimension_numbers<[1], [1], [0], [0], [0, 0, 1, 0], [], []>} : vector<8x8xbf16>, vector<8x8xbf16>, vector<8x8xf32> -> vector<8x8xf32>
    %70 = arith.addf %69, %21 : vector<8x8xf32>
    %cst_32 = arith.constant dense<0xFF800000> : vector<8xf32>
    %71 = vector.multi_reduction <maximumf>, %70, %cst_32 [1] : vector<8x8xf32> to vector<8xf32>
    %72 = vector.shape_cast %71 : vector<8xf32> to vector<8x1xf32>
    %73 = vector.broadcast %72 : vector<8x1xf32> to vector<8x8xf32>
    %74 = arith.subf %70, %73 : vector<8x8xf32>
    %75 = math.exp %74 : vector<8x8xf32>
    %cst_33 = arith.constant dense<0.000000e+00> : vector<8xf32>
    %76 = vector.multi_reduction <add>, %75, %cst_33 [1] : vector<8x8xf32> to vector<8xf32>
    %77 = vector.shape_cast %76 : vector<8xf32> to vector<8x1xf32>
    %78 = tpu.reciprocal %77 {approx = true} : vector<8x1xf32> -> vector<8x1xf32>
    %79 = vector.broadcast %78 : vector<8x1xf32> to vector<8x8xf32>
    %80 = arith.mulf %75, %79 : vector<8x8xf32>
    %81 = arith.truncf %80 : vector<8x8xf32> to vector<8x8xbf16>
    %cst_34 = arith.constant dense<0.000000e+00> : vector<8x8xf32>
    %82 = tpu.matmul %81, %68, %cst_34 {dimension_numbers = #tpu.dot_dimension_numbers<[1], [0], [0], [1], [0, 0, 1, 1], [], []>} : vector<8x8xbf16>, vector<8x8xbf16>, vector<8x8xf32> -> vector<8x8xf32>
    %83 = arith.truncf %82 : vector<8x8xf32> to vector<8x8xbf16>
    %c0_35 = arith.constant 0 : index
    %c16_36 = arith.constant 16 : index
    %84 = vector.load %arg20[%c0_35, %c16_36] : memref<8x32xbf16, #tpu.memory_space<vmem>>, vector<8x8xbf16>
    tpu.vector_store %arg20[%c0_35, %c16_36], %83 {strides = array<i32>} : memref<8x32xbf16, #tpu.memory_space<vmem>>, vector<8x8xbf16>,
    %85 = vector.extract_strided_slice %27 {offsets = [0, 24], sizes = [8, 8], strides = [1, 1]} : vector<8x32xbf16> to vector<8x8xbf16>
    %c0_37 = arith.constant 0 : index
    %c24 = arith.constant 24 : index
    %86 = vector.load %arg19[%c0_37, %c24] : memref<8x64xbf16, #tpu.memory_space<vmem>>, vector<8x8xbf16>
    %c0_38 = arith.constant 0 : index
    %c56 = arith.constant 56 : index
    %87 = vector.load %arg19[%c0_38, %c56] : memref<8x64xbf16, #tpu.memory_space<vmem>>, vector<8x8xbf16>
    %cst_39 = arith.constant dense<0.000000e+00> : vector<8x8xf32>
    %88 = tpu.matmul %85, %86, %cst_39 {dimension_numbers = #tpu.dot_dimension_numbers<[1], [1], [0], [0], [0, 0, 1, 0], [], []>} : vector<8x8xbf16>, vector<8x8xbf16>, vector<8x8xf32> -> vector<8x8xf32>
    %89 = arith.addf %88, %21 : vector<8x8xf32>
    %cst_40 = arith.constant dense<0xFF800000> : vector<8xf32>
    %90 = vector.multi_reduction <maximumf>, %89, %cst_40 [1] : vector<8x8xf32> to vector<8xf32>
    %91 = vector.shape_cast %90 : vector<8xf32> to vector<8x1xf32>
    %92 = vector.broadcast %91 : vector<8x1xf32> to vector<8x8xf32>
    %93 = arith.subf %89, %92 : vector<8x8xf32>
    %94 = math.exp %93 : vector<8x8xf32>
    %cst_41 = arith.constant dense<0.000000e+00> : vector<8xf32>
    %95 = vector.multi_reduction <add>, %94, %cst_41 [1] : vector<8x8xf32> to vector<8xf32>
    %96 = vector.shape_cast %95 : vector<8xf32> to vector<8x1xf32>
    %97 = tpu.reciprocal %96 {approx = true} : vector<8x1xf32> -> vector<8x1xf32>
    %98 = vector.broadcast %97 : vector<8x1xf32> to vector<8x8xf32>
    %99 = arith.mulf %94, %98 : vector<8x8xf32>
    %100 = arith.truncf %99 : vector<8x8xf32> to vector<8x8xbf16>
    %cst_42 = arith.constant dense<0.000000e+00> : vector<8x8xf32>
    %101 = tpu.matmul %100, %87, %cst_42 {dimension_numbers = #tpu.dot_dimension_numbers<[1], [0], [0], [1], [0, 0, 1, 1], [], []>} : vector<8x8xbf16>, vector<8x8xbf16>, vector<8x8xf32> -> vector<8x8xf32>
    %102 = arith.truncf %101 : vector<8x8xf32> to vector<8x8xbf16>
    %c0_43 = arith.constant 0 : index
    %c24_44 = arith.constant 24 : index
    %103 = vector.load %arg20[%c0_43, %c24_44] : memref<8x32xbf16, #tpu.memory_space<vmem>>, vector<8x8xbf16>
    tpu.vector_store %arg20[%c0_43, %c24_44], %102 {strides = array<i32>} : memref<8x32xbf16, #tpu.memory_space<vmem>>, vector<8x8xbf16>,
    %c0_45 = arith.constant 0 : index
    %c0_46 = arith.constant 0 : index
    %104 = vector.load %arg20[%c0_45, %c0_46] : memref<8x32xbf16, #tpu.memory_space<vmem>>, vector<8x32xbf16>
    %c0_47 = arith.constant 0 : index
    %c0_48 = arith.constant 0 : index
    %105 = vector.load %arg8[%c0_47, %c0_48] : memref<32x32xbf16, #tpu.memory_space<vmem>>, vector<32x32xbf16>
    %cst_49 = arith.constant dense<0.000000e+00> : vector<8x32xf32>
    %106 = tpu.matmul %104, %105, %cst_49 {dimension_numbers = #tpu.dot_dimension_numbers<[1], [0], [0], [1], [0, 0, 1, 1], [], []>} : vector<8x32xbf16>, vector<32x32xbf16>, vector<8x32xf32> -> vector<8x32xf32>
    %c0_50 = arith.constant 0 : index
    %c0_51 = arith.constant 0 : index
    %107 = vector.load %arg9[%c0_50, %c0_51] : memref<1x32xf32, #tpu.memory_space<vmem>>, vector<1x32xf32>
    %108 = vector.broadcast %107 : vector<1x32xf32> to vector<8x32xf32>
    %109 = arith.addf %106, %108 : vector<8x32xf32>
    %110 = arith.addf %7, %109 : vector<8x32xf32>
    %c0_52 = arith.constant 0 : index
    %c0_53 = arith.constant 0 : index
    %111 = vector.load %arg14[%c0_52, %c0_53] : memref<1x32xf32, #tpu.memory_space<vmem>>, vector<1x32xf32>
    %c0_54 = arith.constant 0 : index
    %c0_55 = arith.constant 0 : index
    %112 = vector.load %arg15[%c0_54, %c0_55] : memref<1x32xf32, #tpu.memory_space<vmem>>, vector<1x32xf32>
    %cst_56 = arith.constant dense<0.000000e+00> : vector<8xf32>
    %113 = vector.multi_reduction <add>, %110, %cst_56 [1] : vector<8x32xf32> to vector<8xf32>
    %114 = vector.shape_cast %113 : vector<8xf32> to vector<8x1xf32>
    %cst_57 = arith.constant 3.200000e+01 : f32
    %115 = vector.broadcast %cst_57 : f32 to vector<8x1xf32>
    %116 = arith.divf %114, %115 : vector<8x1xf32>
    %117 = vector.broadcast %116 : vector<8x1xf32> to vector<8x32xf32>
    %118 = arith.subf %110, %117 : vector<8x32xf32>
    %119 = arith.mulf %118, %118 : vector<8x32xf32>
    %cst_58 = arith.constant dense<0.000000e+00> : vector<8xf32>
    %120 = vector.multi_reduction <add>, %119, %cst_58 [1] : vector<8x32xf32> to vector<8xf32>
    %121 = vector.shape_cast %120 : vector<8xf32> to vector<8x1xf32>
    %cst_59 = arith.constant 3.200000e+01 : f32
    %122 = vector.broadcast %cst_59 : f32 to vector<8x1xf32>
    %123 = arith.divf %121, %122 : vector<8x1xf32>
    %cst_60 = arith.constant 9.99999974E-6 : f32
    %124 = vector.broadcast %cst_60 : f32 to vector<8x1xf32>
    %125 = arith.addf %123, %124 : vector<8x1xf32>
    %126 = math.rsqrt %125 : vector<8x1xf32>
    %127 = vector.broadcast %126 : vector<8x1xf32> to vector<8x32xf32>
    %128 = arith.mulf %118, %127 : vector<8x32xf32>
    %129 = vector.broadcast %111 : vector<1x32xf32> to vector<8x32xf32>
    %130 = arith.mulf %128, %129 : vector<8x32xf32>
    %131 = vector.broadcast %112 : vector<1x32xf32> to vector<8x32xf32>
    %132 = arith.addf %130, %131 : vector<8x32xf32>
    %133 = arith.truncf %132 : vector<8x32xf32> to vector<8x32xbf16>
    %c0_61 = arith.constant 0 : index
    %c0_62 = arith.constant 0 : index
    %134 = vector.load %arg10[%c0_61, %c0_62] : memref<32x64xbf16, #tpu.memory_space<vmem>>, vector<32x64xbf16>
    %cst_63 = arith.constant dense<0.000000e+00> : vector<8x64xf32>
    %135 = tpu.matmul %133, %134, %cst_63 {dimension_numbers = #tpu.dot_dimension_numbers<[1], [0], [0], [1], [0, 0, 1, 1], [], []>} : vector<8x32xbf16>, vector<32x64xbf16>, vector<8x64xf32> -> vector<8x64xf32>
    %c0_64 = arith.constant 0 : index
    %c0_65 = arith.constant 0 : index
    %136 = vector.load %arg11[%c0_64, %c0_65] : memref<1x64xf32, #tpu.memory_space<vmem>>, vector<1x64xf32>
    %137 = vector.broadcast %136 : vector<1x64xf32> to vector<8x64xf32>
    %138 = arith.addf %135, %137 : vector<8x64xf32>
    %cst_66 = arith.constant 0.000000e+00 : f32
    %139 = vector.broadcast %cst_66 : f32 to vector<8x64xf32>
    %140 = arith.maximumf %138, %139 : vector<8x64xf32>
    %141 = arith.truncf %140 : vector<8x64xf32> to vector<8x64xbf16>
    %c0_67 = arith.constant 0 : index
    %c0_68 = arith.constant 0 : index
    %142 = vector.load %arg12[%c0_67, %c0_68] : memref<64x32xbf16, #tpu.memory_space<vmem>>, vector<64x32xbf16>
    %cst_69 = arith.constant dense<0.000000e+00> : vector<8x32xf32>
    %143 = tpu.matmul %141, %142, %cst_69 {dimension_numbers = #tpu.dot_dimension_numbers<[1], [0], [0], [1], [0, 0, 1, 1], [], []>} : vector<8x64xbf16>, vector<64x32xbf16>, vector<8x32xf32> -> vector<8x32xf32>
    %c0_70 = arith.constant 0 : index
    %c0_71 = arith.constant 0 : index
    %144 = vector.load %arg13[%c0_70, %c0_71] : memref<1x32xf32, #tpu.memory_space<vmem>>, vector<1x32xf32>
    %145 = vector.broadcast %144 : vector<1x32xf32> to vector<8x32xf32>
    %146 = arith.addf %143, %145 : vector<8x32xf32>
    %147 = arith.addf %132, %146 : vector<8x32xf32>
    %c0_72 = arith.constant 0 : index
    %c0_73 = arith.constant 0 : index
    %148 = vector.load %arg16[%c0_72, %c0_73] : memref<1x32xf32, #tpu.memory_space<vmem>>, vector<1x32xf32>
    %c0_74 = arith.constant 0 : index
    %c0_75 = arith.constant 0 : index
    %149 = vector.load %arg17[%c0_74, %c0_75] : memref<1x32xf32, #tpu.memory_space<vmem>>, vector<1x32xf32>
    %cst_76 = arith.constant dense<0.000000e+00> : vector<8xf32>
    %150 = vector.multi_reduction <add>, %147, %cst_76 [1] : vector<8x32xf32> to vector<8xf32>
    %151 = vector.shape_cast %150 : vector<8xf32> to vector<8x1xf32>
    %cst_77 = arith.constant 3.200000e+01 : f32
    %152 = vector.broadcast %cst_77 : f32 to vector<8x1xf32>
    %153 = arith.divf %151, %152 : vector<8x1xf32>
    %154 = vector.broadcast %153 : vector<8x1xf32> to vector<8x32xf32>
    %155 = arith.subf %147, %154 : vector<8x32xf32>
    %156 = arith.mulf %155, %155 : vector<8x32xf32>
    %cst_78 = arith.constant dense<0.000000e+00> : vector<8xf32>
    %157 = vector.multi_reduction <add>, %156, %cst_78 [1] : vector<8x32xf32> to vector<8xf32>
    %158 = vector.shape_cast %157 : vector<8xf32> to vector<8x1xf32>
    %cst_79 = arith.constant 3.200000e+01 : f32
    %159 = vector.broadcast %cst_79 : f32 to vector<8x1xf32>
    %160 = arith.divf %158, %159 : vector<8x1xf32>
    %cst_80 = arith.constant 9.99999974E-6 : f32
    %161 = vector.broadcast %cst_80 : f32 to vector<8x1xf32>
    %162 = arith.addf %160, %161 : vector<8x1xf32>
    %163 = math.rsqrt %162 : vector<8x1xf32>
    %164 = vector.broadcast %163 : vector<8x1xf32> to vector<8x32xf32>
    %165 = arith.mulf %155, %164 : vector<8x32xf32>
    %166 = vector.broadcast %148 : vector<1x32xf32> to vector<8x32xf32>
    %167 = arith.mulf %165, %166 : vector<8x32xf32>
    %168 = vector.broadcast %149 : vector<1x32xf32> to vector<8x32xf32>
    %169 = arith.addf %167, %168 : vector<8x32xf32>
    %c0_81 = arith.constant 0 : index
    %c0_82 = arith.constant 0 : index
    %c0_83 = arith.constant 0 : index
    %170 = vector.load %arg18[%c0_81, %c0_82, %c0_83] : memref<1x8x32xf32, #tpu.memory_space<vmem>>, vector<1x8x32xf32>
    %171 = vector.shape_cast %170 : vector<1x8x32xf32> to vector<8x32xf32>
    %172 = vector.shape_cast %169 : vector<8x32xf32> to vector<1x8x32xf32>
    tpu.vector_store %arg18[%c0_81, %c0_82, %c0_83], %172 {strides = array<i32>} : memref<1x8x32xf32, #tpu.memory_space<vmem>>, vector<1x8x32xf32>,
    return
  }
  func.func @transform_0(%arg0: i32, %arg1: i32) -> (i32, i32, i32) {
    %c0_i32 = arith.constant 0 : i32
    %c0_i32_0 = arith.constant 0 : i32
    %c0_i32_1 = arith.constant 0 : i32
    return %arg0, %c0_i32, %c0_i32_0 : i32, i32, i32
  }
  func.func @transform_1(%arg0: i32, %arg1: i32) -> (i32, i32, i32) {
    %c0_i32 = arith.constant 0 : i32
    %c0_i32_0 = arith.constant 0 : i32
    %c0_i32_1 = arith.constant 0 : i32
    return %arg0, %c0_i32, %c0_i32_0 : i32, i32, i32
  }
  func.func @transform_2(%arg0: i32, %arg1: i32) -> (i32, i32) {
    %c0_i32 = arith.constant 0 : i32
    %c0_i32_0 = arith.constant 0 : i32
    %c0_i32_1 = arith.constant 0 : i32
    return %c0_i32, %c0_i32_0 : i32, i32
  }
  func.func @transform_3(%arg0: i32, %arg1: i32) -> (i32, i32) {
    %c0_i32 = arith.constant 0 : i32
    %c0_i32_0 = arith.constant 0 : i32
    %c0_i32_1 = arith.constant 0 : i32
    return %c0_i32, %c0_i32_0 : i32, i32
  }
  func.func @transform_4(%arg0: i32, %arg1: i32) -> (i32, i32) {
    %c0_i32 = arith.constant 0 : i32
    %c0_i32_0 = arith.constant 0 : i32
    %c0_i32_1 = arith.constant 0 : i32
    return %c0_i32, %c0_i32_0 : i32, i32
  }
  func.func @transform_5(%arg0: i32, %arg1: i32) -> (i32, i32) {
    %c0_i32 = arith.constant 0 : i32
    %c0_i32_0 = arith.constant 0 : i32
    %c0_i32_1 = arith.constant 0 : i32
    return %c0_i32, %c0_i32_0 : i32, i32
  }
  func.func @transform_6(%arg0: i32, %arg1: i32) -> (i32, i32) {
    %c0_i32 = arith.constant 0 : i32
    %c0_i32_0 = arith.constant 0 : i32
    %c0_i32_1 = arith.constant 0 : i32
    return %c0_i32, %c0_i32_0 : i32, i32
  }
  func.func @transform_7(%arg0: i32, %arg1: i32) -> (i32, i32) {
    %c0_i32 = arith.constant 0 : i32
    %c0_i32_0 = arith.constant 0 : i32
    %c0_i32_1 = arith.constant 0 : i32
    return %c0_i32, %c0_i32_0 : i32, i32
  }
  func.func @transform_8(%arg0: i32, %arg1: i32) -> (i32, i32) {
    %c0_i32 = arith.constant 0 : i32
    %c0_i32_0 = arith.constant 0 : i32
    %c0_i32_1 = arith.constant 0 : i32
    return %c0_i32, %c0_i32_0 : i32, i32
  }
  func.func @transform_9(%arg0: i32, %arg1: i32) -> (i32, i32) {
    %c0_i32 = arith.constant 0 : i32
    %c0_i32_0 = arith.constant 0 : i32
    %c0_i32_1 = arith.constant 0 : i32
    return %c0_i32, %c0_i32_0 : i32, i32
  }
  func.func @transform_10(%arg0: i32, %arg1: i32) -> (i32, i32) {
    %c0_i32 = arith.constant 0 : i32
    %c0_i32_0 = arith.constant 0 : i32
    %c0_i32_1 = arith.constant 0 : i32
    return %c0_i32, %c0_i32_0 : i32, i32
  }
  func.func @transform_11(%arg0: i32, %arg1: i32) -> (i32, i32) {
    %c0_i32 = arith.constant 0 : i32
    %c0_i32_0 = arith.constant 0 : i32
    %c0_i32_1 = arith.constant 0 : i32
    return %c0_i32, %c0_i32_0 : i32, i32
  }
  func.func @transform_12(%arg0: i32, %arg1: i32) -> (i32, i32) {
    %c0_i32 = arith.constant 0 : i32
    %c0_i32_0 = arith.constant 0 : i32
    %c0_i32_1 = arith.constant 0 : i32
    return %c0_i32, %c0_i32_0 : i32, i32
  }
  func.func @transform_13(%arg0: i32, %arg1: i32) -> (i32, i32) {
    %c0_i32 = arith.constant 0 : i32
    %c0_i32_0 = arith.constant 0 : i32
    %c0_i32_1 = arith.constant 0 : i32
    return %c0_i32, %c0_i32_0 : i32, i32
  }
  func.func @transform_14(%arg0: i32, %arg1: i32) -> (i32, i32) {
    %c0_i32 = arith.constant 0 : i32
    %c0_i32_0 = arith.constant 0 : i32
    %c0_i32_1 = arith.constant 0 : i32
    return %c0_i32, %c0_i32_0 : i32, i32
  }
  func.func @transform_15(%arg0: i32, %arg1: i32) -> (i32, i32) {
    %c0_i32 = arith.constant 0 : i32
    %c0_i32_0 = arith.constant 0 : i32
    %c0_i32_1 = arith.constant 0 : i32
    return %c0_i32, %c0_i32_0 : i32, i32
  }
  func.func @transform_16(%arg0: i32, %arg1: i32) -> (i32, i32, i32) {
    %c0_i32 = arith.constant 0 : i32
    %c0_i32_0 = arith.constant 0 : i32
    return %arg0, %arg1, %c0_i32 : i32, i32, i32
  }
}

</mosaic_0001>

<bundles_post_ra>
// kernel: tpu_custom_call.1
= control target key start
LH: loop header
LB: loop body
LE: loop exit
PB: predicated region body
PF: predicated region fallthrough
CT: control target
= control target key end

     0   :  { %s2526_s0 = inlined_call_operand.vmem [shape: f32[2,8,32], index: 0, kind: input, shape index: {}]   ;;  %s2527_s1 = inlined_call_operand.vmem [shape: f32[2,1,8], index: 1, kind: input, shape index: {}]   ;;  %s2528_s2 = inlined_call_operand.vmem [shape: bf16[32,32], index: 2, kind: input, shape index: {}]   ;;  %s2529_s3 = inlined_call_operand.vmem [shape: f32[1,32], index: 3, kind: input, shape index: {}]   ;;  %s2530_s4 = inlined_call_operand.vmem [shape: bf16[32,64], index: 4, kind: input, shape index: {}]   ;;  %s2531_s5 = inlined_call_operand.vmem [shape: f32[1,64], index: 5, kind: input, shape index: {}]   ;;  %s2532_s6 = inlined_call_operand.hbm [shape: bf16[32,32], index: 6, kind: input, shape index: {}]   ;;  %s2533_s7 = inlined_call_operand.vmem [shape: f32[1,32], index: 7, kind: input, shape index: {}]   ;;  %s2534_s8 = inlined_call_operand.hbm [shape: bf16[32,64], index: 8, kind: input, shape index: {}]   ;;  %s2535_s9 = inlined_call_operand.vmem [shape: f32[1,64], index: 9, kind: input, shape index: {}]   ;;  %s2536_s10 = inlined_call_operand.vmem [shape: bf16[64,32], index: 10, kind: input, shape index: {}]   ;;  %s2537_s11 = inlined_call_operand.vmem [shape: f32[1,32], index: 11, kind: input, shape index: {}]   ;;  %s2538_s12 = inlined_call_operand.vmem [shape: f32[1,32], index: 12, kind: input, shape index: {}]   ;;  %s2539_s13 = inlined_call_operand.vmem [shape: f32[1,32], index: 13, kind: input, shape index: {}]   ;;  %s2540_s14 = inlined_call_operand.vmem [shape: f32[1,32], index: 14, kind: input, shape index: {}]   ;;  %s2541_s15 = inlined_call_operand.vmem [shape: f32[1,32], index: 15, kind: input, shape index: {}]   ;;  %s2542_s16 = inlined_call_operand.hbm [shape: f32[2,8,32], index: 16, kind: output, shape index: {}]  }
   0x1   :  { %2557 = sst [smem:[#allocation21_spill]] %s2526_s0 }
   0x2   :  { %2558 = sst [smem:[#allocation22_spill]] %s2540_s14 }
   0x3   :  { %2559 = sst [smem:[#allocation23_spill]] %s2541_s15 }
   0x4   :  { %2560 = sst [smem:[#allocation24_spill]] %s2542_s16 }
   0x5   :  { %21 = vsyncpa [#allocation5], 0 }
   0x6   :  { %22 = vsyncpa [#allocation8], 0 }
   0x7   :  { %23 = vsyncpa [#allocation6], 0 }
   0x8   :  { %25 = vsyncpa [#allocation6 + $0x1], 0  ;;  %s2179_s21 = smov 0   ;;  %s2181_s22 = smov 0  }
   0x9   :  { %s2183_s23 = smov 0   ;;  %s2185_s24 = smov 0  }
   0xa   :  { %s2187_s25 = smov 0   ;;  %s2189_s26 = smov 0  }
   0xb LB: > { %2561 = sst [smem:[#allocation13_spill]] %s2055_s21  ;;  %s1622_s27 = sadd.s32 4294967295, %s2075_s26   ;;  %s2075_s26 = sphi %s2189_s26, %s31_s26   ;;  %s2071_s25 = sphi %s2187_s25, %s2589_s25   ;;  %s2067_s24 = sphi %s2185_s24, %s2588_s24   ;;  %s2063_s23 = sphi %s2183_s23, %s2587_s23   ;;  %s2059_s22 = sphi %s2181_s22, %s2591_s22   ;;  %s2055_s21 = sphi %s2179_s21, %s2590_s21  }
   0xc   : > { %2562 = sst [smem:[#allocation14_spill]] %s2063_s23  ;;  %s1623_s28 = sadd.s32 4294967294, %s2075_s26  }
   0xd   : > { %2563 = sst [smem:[#allocation15_spill]] %s2071_s25  ;;  %s43_s29 = sadd.s32 1, %s2071_s25 }
   0xe   : > { %2564 = sst [smem:[#allocation16_spill]] %s2075_s26  ;;  %s398_s30 = sadd.s32 1, %s2063_s23 }
   0xf   : > { %p45_p0 = scmp.ge.s32.totalorder %s43_s29, 2  ;;  %p408_p1 = scmp.ne.s32.totalorder %s2063_s23, %s2059_s22 }
  0x10   : > { %p409_p2 = scmp.eq.s32.totalorder %s1622_s27, 1  ;;  %p414_p3 = scmp.ne.s32.totalorder %s2059_s22, %s2055_s21 }
  0x11   : > { %s2593_s29 = smov (%p45_p0, %s43_s29), 0  ;;  %p415_p5 = scmp.eq.s32.totalorder %s1623_s28, 1 }
  0x12   : > { %2565 = sst [smem:[#allocation17_spill]] %s2593_s29  ;;  %p2219_p4 = por %p409_p2, %p408_p1 }
  0x13   : > { %s393_s17 = ssub.s32 %s2071_s25, %s2593_s29  ;;  %p1624_p6 = scmp.ge.s32.totalorder %s2075_s26, 1 }
  0x14   : > { %s2566_s0 = scalar_select %p2219_p4, 1, 0 }
  0x15   : > { %p396_p7 = scmp.eq.s32.totalorder %s393_s17, 0  ;;  %p2226_p8 = por %p415_p5, %p414_p3 }
  0x16   : > { %2567 = sst [smem:[#allocation18_spill]] %s2566_s0  ;;  %p422_p9 = scmp.lt.s32.totalorder %s2075_s26, 3 }
  0x17   : > { %s2568_s18 = scalar_select %p2226_p8, 1, 0 }
  0x18   : > { %s2232_s19 = scalar_select %p396_p7, %s2063_s23, %s398_s30  }
  0x19   : > { %2569 = sst [smem:[#allocation19_spill]] %s2568_s18  ;;  %p2234_p10 = pnand %p1624_p6, %p422_p9 }
  0x1a   : > { %2570 = sst [smem:[#allocation20_spill]] %s2232_s19  ;;  %p2238_p11 = scmp.eq.s32.totalorder %s1622_s27, 0 }
  0x1b   : > { %s2571_s20 = scalar_select %p2234_p10, 1, 0 }
  0x1c   : > { %s2572_s21 = scalar_select %p2238_p11, 1, 0 }
  0x1d   : > { %p1817_p12 = pneg %p2234_p10  ;;  %s2077_s28 = smov [#allocation4]  }
  0x1e   : > { %s446_s17 = sshll.u32 %s2077_s28, 4  ;;  %s2078_s30 = smov [#allocation7]   ;;  %s447_s17 = int_to_ptr.vmem [resolvable:$true] %s446_s17 }
  0x1f   : > { %p2246_p13 = pnand %p2238_p11, %p1817_p12  ;;  %s462_s25 = sshll.u32 %s2078_s30, 4  ;;  %s2250_s25 = int_to_ptr.vmem [resolvable:$true] %s462_s25 }
  0x20   : > { %s1933_s23 = scalar_lea.hbm %s2532_s6, 256 }
  0x21   : > { %p1934_p0 = scmp.ne.s32.totalorder %s2532_s6, %s1933_s23  ;;  %p1935_p1 = pneg %p2246_p13 }
  0x22   : > { %p1940_p5 = scmp.lt.u32.totalorder %s1933_s23, %s2532_s6 }
  0x23   : > { %p1936_p2 = pnand %p1935_p1, %p1934_p0 }
  0x25   : > { %p1937_p3 = pneg %p1936_p2 }
  0x27   : > { %p1942_p6 = pnand %p1940_p5, %p1937_p3 }
  0x29   : > { %1945 = shalt.err (!%p1942_p6)
}
  0x2a   : > { %s1946_s30 = scalar_lea.vmem %s447_s17, 256  ;;  %p1954_p8 = scmp.lt.s32.totalorder %s447_s17, %s447_s17 }
  0x2b   : > { %p1947_p7 = scmp.ne.s32.totalorder %s447_s17, %s1946_s30  ;;  %p1955_p4 = scmp.lt.s32.totalorder %s1946_s30, %s1946_s30 }
  0x2d   : > { %p1949_p9 = pnand %p1947_p7, %p1935_p1  ;;  %p1956_p11 = por %p1955_p4, %p1954_p8 }
  0x2f   : > { %p1950_p12 = pneg %p1949_p9 }
  0x31   : > { %p1957_p10 = pnand %p1956_p11, %p1950_p12 }
  0x33   : > { %1960 = shalt.err (!%p1957_p10)
}
  0x34   : > { %s2079_s26 = smov 64   ;;  %s2080_s18 = smov 4  }
  0x35   : > { %1820 = dma.hbm_to_vmem [thread:$0]  (!%p2246_p13), %s2532_s6, 256, %s447_s17, [#allocation5], %s2079_s26, %s2079_s26, %s2080_s18  }
  0x36   : > { %s1961_s28 = scalar_lea.hbm %s2534_s8, 256 }
  0x37   : > { %p1962_p0 = scmp.ne.s32.totalorder %s2534_s8, %s1961_s28  ;;  %p1968_p10 = scmp.lt.u32.totalorder %s1961_s28, %s2534_s8 }
  0x39   : > { %p1964_p4 = pnand %p1962_p0, %p1935_p1 }
  0x3b   : > { %p1965_p8 = pneg %p1964_p4 }
  0x3d   : > { %p1970_p11 = pnand %p1968_p10, %p1965_p8 }
  0x3f   : > { %1973 = shalt.err (!%p1970_p11)
}
  0x40   : > { %s1974_s17 = scalar_lea.vmem %s2250_s25, 256  ;;  %p1982_p6 = scmp.lt.s32.totalorder %s2250_s25, %s2250_s25 }
  0x41   : > { %p1975_p2 = scmp.ne.s32.totalorder %s2250_s25, %s1974_s17  ;;  %p1983_p7 = scmp.lt.s32.totalorder %s1974_s17, %s1974_s17 }
  0x43   : > { %p1977_p3 = pnand %p1975_p2, %p1935_p1  ;;  %p1984_p9 = por %p1983_p7, %p1982_p6 }
  0x45   : > { %p1978_p5 = pneg %p1977_p3 }
  0x47   : > { %p1985_p12 = pnand %p1984_p9, %p1978_p5 }
  0x49   : > { %1988 = shalt.err (!%p1985_p12)
}
  0x4a   : > { %1823 = dma.hbm_to_vmem [thread:$0]  (!%p2246_p13), %s2534_s8, 256, %s2250_s25, [#allocation8], %s2079_s26, %s2079_s26, %s2080_s18  }
  0x4b   : > { %p2574_p0 = scmp.ne.s32.totalorder %s2571_s20, 0 }
  0x4c   : > { %p2575_p4 = scmp.ne.s32.totalorder (!%p2574_p0), %s2572_s21, 0 }
  0x4d   : > { %512 = sbr.rel (%p2574_p0) target bundleno = 2630 (0xa46), region = 84 }
  0x54   : > { %2042 = dma.done.wait (%p2575_p4), [#allocation5], 256  }
  0x55   : > { %2044 = vsyncadd (%p2575_p4), [#allocation5], 4294967040 }
  0x56   : > { %2046 = dma.done.wait (%p2575_p4), [#allocation8], 256  }
  0x57   : > { %2048 = vsyncadd (%p2575_p4), [#allocation8], 4294967040  ;;  %p568_p1 = scmp.lt.s32.totalorder %s2067_s24, 1  ;;  %v2081_v0 = vmov 0.0   ;;  %vm2082_vm0 = vmmov 0   ;;  %s2576_s20 = sld [smem:[#allocation21_spill]]  ;;  %v656_v35 = vlaneseq }
  0x58   : > { %1715 = vmatprep.subr.bf16.mxu1 %v2081_v0  ;;  %1719 = vmatprep.mubr.msk.bf16.mxu1 %vm2082_vm0, %v2081_v0  ;;  %v1897_v1 = vld [vmem:[%s2530_s4] sm:$0xff]   ;;  %v1898_v2 = vld [vmem:[%s2530_s4 + $0x8] sm:$0xff]   ;;  %vm605_vm1 = vcmask 261120   ;;  %vm650_vm2 = vcmask 519168   ;;  %vm741_vm3 = vcmask 64512   ;;  %s2083_s0 = smov 112  }
  0x59   : > { %s2314_s25 = scalar_select %p568_p1, %s2067_s24, 1  ;;  %1731 = vmatprep.subr.bf16.mxu0 %v2081_v0  ;;  %1733 = vmatprep.mubr.msk.bf16.mxu0 %vm2082_vm0, %v2081_v0  ;;  %v1899_v4 = vld [vmem:[%s2528_s2] sm:$0xff]   ;;  %v1900_v6 = vld [vmem:[%s2528_s2 + $0x8] sm:$0xff]   ;;  %v657_v36 = vshrl.u32 %v656_v35, 7  ;;  %v661_v37 = vand.u32 127, %v656_v35  ;;  %vm808_vm5 = vcmask 1043456  }
  0x5a   : > { %1716 = vmatpush3.bf16.msra.mxu1 %v1897_v1  ;;  %v1633_v7 = vld [vmem:[%s2531_s5] ss:$0 sm:$0xff]  ;;  %s2087_s19 = smov 80   ;;  %s2088_s27 = smov 72   ;;  %vm853_vm6 = vcmask 60416   ;;  %vm977_vm7 = vcmask 126016  }
  0x5b   : > { %s1632_s21 = sshll.u32 %s2314_s25, 3  ;;  %1717 = vmatprep.subr.bf16.mxu1 %v2081_v0  ;;  %v1638_v14 = vld [vmem:[%s2529_s3] ss:$0 sm:$0xff]  ;;  %s574_s23 = scalar_lea.vmem %s2527_s1, %s2314_s25  ;;  %vm662_vm4 = vcmp.gt.s32.totalorder %v661_v37, %v657_v36  ;;  %vm1100_vm8 = vcmask 191616   ;;  %vm1223_vm9 = vcmask 257216   ;;  %vm1431_vm10 = vcmask 523264  }
  0x5c   : > { %v663_v38 = vsel %vm662_vm4, -1e+30, %v2081_v0  ;;  %v1637_v39 = vld [vmem:[%s574_s23] ss:$0 sm:$0xff]  ;;  %s2086_s25 = smov 96   ;;  %s2089_s28 = smov 88  }
  0x5d   : > { %s571_s26 = scalar_lea.vmem %s2576_s20, %s1632_s21  ;;  %s2084_s20 = smov 120   ;;  %v671_v40 = vadd.f32 %v1637_v39, %v663_v38 }
  0x5e   : > { %v2329_v3 = vld [vmem:[%s571_s26] sm:$0xff]  ;;  %1718 = vmatpush3.bf16.msra.mxu1 %v1898_v2  ;;  %s2085_s26 = smov 104   ;;  %s2090_s30 = smov 8  }
  0x5f   : > { %v581_v5 = vpack.c.bf16 %v2329_v3, %v2329_v3  ;;  %1723 = vmatprep.subr.bf16.mxu1 %v2081_v0  ;;  %s2091_s17 = smov 16   ;;  %s2092_s14 = smov 24  }
  0x60   : > { %s565_s29 = sand.u32 1, %s2059_s22   ;;  %s2578_s16 = sld [smem:[#allocation22_spill]] }
  0x61   : > { %1720 = vmatmul.mubr.msk.bf16.vlgmr.msra.gmra.mrb[0].mxu1 %vm605_vm1, %v581_v5  ;;  %s2580_s15 = sld [smem:[#allocation24_spill]] }
  0x62   : > { %1724 = vmatpush3.bf16.msra.mxu1 %v1899_v4  ;;  %1727 = vmatprep.mubr.msk.bf16.mxu1 %vm2082_vm0, %v2081_v0 }
  0x63   : > { %1725 = vmatprep.subr.bf16.mxu1 %v2081_v0 }
  0x66   : > { %1726 = vmatpush3.bf16.msra.mxu1 %v1900_v6 }
  0x67   : > { %1737 = vmatprep.subr.bf16.mxu1 %v2081_v0 }
  0x69   : > { %1728 = vmatmul.mubr.msk.bf16.vlgmr.msra.gmra.mrb[4].mxu1 %vm605_vm1, %v581_v5 }
  0x6a   : > { %1739 = vmatprep.mubr.msk.bf16.mxu1 %vm2082_vm0, %v2081_v0 }
 0x134   : > { %v643_v8 = vpop.f32.mrb[0].mxu1 }
 0x135   : > { %v644_v9 = vadd.f32 %v1633_v7, %v643_v8  ;;  %v1721_v10 = vpop.f32.mrb[1].mxu1 }
 0x136   : > { %v646_v11 = vpop.f32.mrb[2].mxu1 }
 0x137   : > { %v649_v12 = vpack.c.bf16 %v644_v9, %v644_v9  ;;  %v1722_v13 = vpop.f32.mrb[3].mxu1 }
 0x139   : > { %651 = vst.msk [vmem:[#allocation2] sm:$0xf] %vm650_vm2, %v649_v12 }
 0x13c   : > { %v733_v15 = vpop.f32.mrb[4].mxu1 }
 0x13d   : > { %v1729_v16 = vpop.f32.mrb[5].mxu1  ;;  %v734_v17 = vadd.f32 %v1638_v14, %v733_v15 }
 0x13e   : > { %v736_v18 = vpop.f32.mrb[6].mxu1 }
 0x13f   : > { %v1730_v19 = vpop.f32.mrb[7].mxu1  ;;  %v739_v24 = vpack.c.bf16 %v734_v17, %v734_v17 }
 0x140   : > { %v2355_v20 = vld [vmem:[#allocation2] sm:$0xf] }
 0x141   : > { %v2357_v21 = vld [vmem:[#allocation2] ss:$0 sps:$4 sm:$0xff]   ;;  %v746_v22 = vsel %vm741_vm3, %v2355_v20, 0  ;;  %v1643_v8 = vcombine.low %v2355_v20, %v2355_v20 }
 0x142   : > { %v2361_v23 = vld [vmem:[#allocation2] ss:$0 sps:$4 sm:$0xff]   ;;  %1732 = vmatpush3.bf16.xpose.msra.mxu0 %v746_v22  ;;  %985 = vrot.lane.b32.xlu1 %v2357_v21, %s2083_s0 }
 0x143   : > { %862 = vrot.lane.b32.xlu0 %v2361_v23, %s2084_s20  ;;  %1743 = vmatprep.subr.bf16.mxu0 %v2081_v0  ;;  %v2367_v25 = vld [vmem:[#allocation2] ss:$0 sps:$4 sm:$0xff]  }
 0x146   : > { %980 = vrot.lane.b32.xlu1 %v739_v24, %s2083_s0  ;;  %s1631_s0 = sshll.u32 %s565_s29, 3 }
 0x147   : > { %857 = vrot.lane.b32.xlu0 %v739_v24, %s2084_s20  ;;  %s2577_s20 = sld [smem:[#allocation18_spill]] }
 0x149   : > { %1734 = vmatmul.mubr.msk.bf16.vlgmr.msra.gmra.mrb[0].mxu0 %vm741_vm3, %v739_v24 }
 0x14a   : > { %1103 = vrot.lane.b32.xlu1 %v739_v24, %s2085_s26  ;;  %1745 = vmatprep.mubr.msk.bf16.mxu0 %vm2082_vm0, %v2081_v0 }
 0x14b   : > { %1108 = vrot.lane.b32.xlu0 %v2367_v25, %s2085_s26  ;;  %s1507_s26 = scalar_lea.sflag [#allocation6], %s565_s29 }
 0x14d   : > { %p2581_p8 = scmp.ne.s32.totalorder %s2577_s20, 0 }
 0x1b4   : > { %v986_v28 = vpop.permute.xlu1 %985 }
 0x1b5   : > { %v863_v26 = vpop.permute.xlu0 %862  ;;  %v991_v30 = vsel %vm741_vm3, %v986_v28, 0 }
 0x1b6   : > { %v868_v27 = vsel %vm741_vm3, %v863_v26, 0 }
 0x1b7   : > { %1744 = vmatpush3.bf16.xpose.msra.mxu0 %v868_v27 }
 0x1b8   : > { %1755 = vmatprep.subr.bf16.mxu0 %v2081_v0  ;;  %v981_v32 = vpop.permute.xlu1 %980 }
 0x1b9   : > { %v858_v29 = vpop.permute.xlu0 %857 }
 0x1bc   : > { %v1104_v34 = vpop.permute.xlu1 %1103 }
 0x1bd   : > { %v1109_v31 = vpop.permute.xlu0 %1108 }
 0x1be   : > { %1746 = vmatmul.mubr.msk.bf16.vlgmr.msra.gmra.mrb[4].mxu0 %vm741_vm3, %v858_v29  ;;  %v1114_v33 = vsel %vm741_vm3, %v1109_v31, 0 }
 0x1bf   : > { %1756 = vmatpush3.bf16.xpose.msra.mxu0 %v991_v30  ;;  %1757 = vmatprep.mubr.msk.bf16.mxu0 %vm2082_vm0, %v2081_v0 }
 0x1c0   : > { %1767 = vmatprep.subr.bf16.mxu0 %v2081_v0 }
 0x1c6   : > { %1758 = vmatmul.mubr.msk.bf16.vlgmr.msra.gmra.mrb[8].mxu0 %vm741_vm3, %v981_v32 }
 0x1c7   : > { %1768 = vmatpush3.bf16.xpose.msra.mxu0 %v1114_v33  ;;  %1769 = vmatprep.mubr.msk.bf16.mxu0 %vm2082_vm0, %v2081_v0 }
 0x1c8   : > { %1779 = vmatprep.subr.bf16.mxu0 %v2081_v0 }
 0x1ce   : > { %1770 = vmatmul.mubr.msk.bf16.vlgmr.msra.gmra.mrb[12].mxu0 %vm741_vm3, %v1104_v34 }
 0x1cf   : > { %1783 = vmatprep.mubr.msk.bf16.mxu0 %vm2082_vm0, %v2081_v0 }
 0x21c   : > { %v782_v41 = vpop.f32.mrb[0].mxu0 }
 0x21d   : > { %v783_v42 = vadd.f32 %v782_v41, %v671_v40  ;;  %v1735_v43 = vpop.f32.mrb[1].mxu0 }
 0x21e   : > { %v785_v44 = vpop.f32.mrb[2].mxu0 }
 0x21f   : > { %v1736_v45 = vpop.f32.mrb[3].mxu0  ;;  %v788_v46 = vsel %vm741_vm3, %v783_v42, -inf }
 0x220   : > { %789 = vmax.xlane.f32.xlu0 %v788_v46 }
 0x291   : > { %v904_v47 = vpop.f32.mrb[4].mxu0 }
 0x292   : > { %v905_v48 = vadd.f32 %v904_v47, %v671_v40  ;;  %v1747_v49 = vpop.f32.mrb[5].mxu0 }
 0x293   : > { %v907_v50 = vpop.f32.mrb[6].mxu0 }
 0x294   : > { %v1748_v51 = vpop.f32.mrb[7].mxu0  ;;  %v910_v52 = vsel %vm741_vm3, %v905_v48, -inf }
 0x295   : > { %911 = vmax.xlane.f32.xlu1 %v910_v52 }
 0x299   : > { %v1027_v53 = vpop.f32.mrb[8].mxu0 }
 0x29a   : > { %v1028_v54 = vadd.f32 %v1027_v53, %v671_v40  ;;  %v1759_v55 = vpop.f32.mrb[9].mxu0 }
 0x29b   : > { %v1030_v56 = vpop.f32.mrb[10].mxu0 }
 0x29c   : > { %v1760_v57 = vpop.f32.mrb[11].mxu0  ;;  %v1033_v58 = vsel %vm741_vm3, %v1028_v54, -inf }
 0x29d   : > { %1034 = vmax.xlane.f32.xlu0 %v1033_v58  ;;  %v1905_v58 = vld [vmem:[#allocation4] sm:$0xff]  }
 0x29e   : > { %1780 = vmatpush3.bf16.msra.mxu0 %v1905_v58 }
 0x29f   : > { %1781 = vmatprep.subr.bf16.mxu0 %v2081_v0 }
 0x2a1   : > { %v1150_v59 = vpop.f32.mrb[12].mxu0 }
 0x2a2   : > { %v1151_v60 = vadd.f32 %v1150_v59, %v671_v40  ;;  %v1771_v61 = vpop.f32.mrb[13].mxu0 }
 0x2a3   : > { %v1153_v62 = vpop.f32.mrb[14].mxu0 }
 0x2a4   : > { %v1772_v63 = vpop.f32.mrb[15].mxu0  ;;  %v1156_v1 = vsel %vm741_vm3, %v1151_v60, -inf }
 0x2a5   : > { %1157 = vmax.xlane.f32.xlu0 %v1156_v1 }
 0x2ad   : > { %v790_v2 = vpop.xlane.xlu0 %789 }
 0x2ae   : > { %v791_v4 = vsub.f32 %v783_v42, %v790_v2 }
 0x2b0   : > { %v792_v5 = vmul.f32 1.442695, %v791_v4 }
 0x2b2   : > { %1913 = vpow2.f32 %v792_v5 }
 0x2bc   : > { %v1914_v6 = vpop.eup %1913 }
 0x2bd   : > { %v794_v7 = vsel %vm741_vm3, %v1914_v6, 0.0 }
 0x2be   : > { %795 = vadd.xlane.f32.xlu1 %v794_v7 }
 0x2cf   : > { %803 = vrot.lane.b32.xlu1 %v1643_v8, %s2086_s25 }
 0x322   : > { %v912_v9 = vpop.xlane.xlu1 %911 }
 0x323   : > { %v913_v10 = vsub.f32 %v905_v48, %v912_v9 }
 0x325   : > { %v914_v11 = vmul.f32 1.442695, %v913_v10 }
 0x327   : > { %1915 = vpow2.f32 %v914_v11 }
 0x32a   : > { %v1035_v12 = vpop.xlane.xlu0 %1034 }
 0x32b   : > { %v1036_v13 = vsub.f32 %v1028_v54, %v1035_v12  ;;  %v1657_v12 = vld [vmem:[%s2533_s7] ss:$0 sm:$0xff] }
 0x32d   : > { %v1037_v14 = vmul.f32 1.442695, %v1036_v13 }
 0x32f   : > { %1917 = vpow2.f32 %v1037_v14 }
 0x331   : > { %v1916_v15 = vpop.eup %1915 }
 0x332   : > { %v1158_v16 = vpop.xlane.xlu0 %1157  ;;  %v916_v17 = vsel %vm741_vm3, %v1916_v15, 0.0 }
 0x333   : > { %v1159_v18 = vsub.f32 %v1151_v60, %v1158_v16  ;;  %917 = vadd.xlane.f32.xlu0 %v916_v17  ;;  %v1906_v60 = vld [vmem:[#allocation4 + $0x8] sm:$0xff]  }
 0x334   : > { %1782 = vmatpush3.bf16.msra.mxu0 %v1906_v60 }
 0x335   : > { %v1160_v19 = vmul.f32 1.442695, %v1159_v18  ;;  %1795 = vmatprep.subr.bf16.mxu0 %v2081_v0 }
 0x337   : > { %1919 = vpow2.f32 %v1160_v19 }
 0x339   : > { %v1918_v22 = vpop.eup %1917 }
 0x33a   : > { %v1039_v20 = vsel %vm741_vm3, %v1918_v22, 0.0 }
 0x33b   : > { %1040 = vadd.xlane.f32.xlu1 %v1039_v20 }
 0x341   : > { %v1920_v24 = vpop.eup %1919 }
 0x342   : > { %v1162_v26 = vsel %vm741_vm3, %v1920_v24, 0.0 }
 0x343   : > { %1163 = vadd.xlane.f32.xlu0 %v1162_v26 }
 0x34b   : > { %v796_v27 = vpop.xlane.xlu1 %795 }
 0x34c   : > { %1921 = vrcp.f32 %v796_v27  ;;  %1045 = vrot.lane.b32.xlu1 %v2357_v21, %s2087_s19  ;;  %s2579_s19 = sld [smem:[#allocation23_spill]] }
 0x34f   : > { %v804_v28 = vpop.permute.xlu1 %803 }
 0x350   : > { %v810_v29 = vsel %vm808_vm5, %v804_v28, 0  ;;  %1168 = vrot.lane.b32.xlu1 %v2367_v25, %s2088_s27  ;;  %v1907_v28 = vld [vmem:[#allocation7] sm:$0xff]   ;;  %s1676_s27 = sshll.u32 %s2067_s24, 7  ;;  %s2093_s24 = smov [#allocation9]  }
 0x351   : > { %1738 = vmatpush3.bf16.msra.mxu1 %v810_v29  ;;  %v1908_v29 = vld [vmem:[#allocation7 + $0x8] sm:$0xff]   ;;  %s2478_s21 = scalar_lea.hbm %s2580_s15, %s1676_s27 }
 0x352   : > { %1749 = vmatprep.subr.bf16.mxu1 %v2081_v0 }
 0x356   : > { %v1922_v30 = vpop.eup %1921 }
 0x357   : > { %v798_v31 = vmul.f32 %v1922_v30, %v1914_v6  ;;  %v1910_v30 = vld [vmem:[%s2536_s10 + $0x8] sm:$0xff]  }
 0x359   : > { %922 = vrot.lane.b32.xlu0 %v2361_v23, %s2089_s28  ;;  %v799_v32 = vpack.c.bf16 %v798_v31, %v798_v31  ;;  %s567_s28 = scalar_lea.vmem [#allocation9], %s1631_s0  ;;  %s1993_s0 = sshll.u32 %s2093_s24, 4  ;;  %s1994_s0 = int_to_ptr.vmem [resolvable:$false] %s1993_s0 }
 0x35b   : > { %1740 = vmatmul.mubr.msk.bf16.vlgmr.msra.gmra.mrb[8].mxu1 %vm741_vm3, %v799_v32 }
 0x35c   : > { %1751 = vmatprep.mubr.msk.bf16.mxu1 %vm2082_vm0, %v2081_v0 }
 0x3c0   : > { %v918_v21 = vpop.xlane.xlu0 %917 }
 0x3c1   : > { %1923 = vrcp.f32 %v918_v21 }
 0x3c8   : > { %v1041_v33 = vpop.xlane.xlu1 %1040 }
 0x3c9   : > { %1925 = vrcp.f32 %v1041_v33 }
 0x3cb   : > { %v1924_v34 = vpop.eup %1923 }
 0x3cc   : > { %v920_v35 = vmul.f32 %v1924_v34, %v1916_v15  ;;  %v1046_v38 = vpop.permute.xlu1 %1045  ;;  %v1661_v34 = vld [vmem:[%s2538_s12] ss:$0 sm:$0xff] }
 0x3cd   : > { %v1051_v40 = vsel %vm808_vm5, %v1046_v38, 0 }
 0x3ce   : > { %v921_v23 = vpack.c.bf16 %v920_v35, %v920_v35  ;;  %v1662_v35 = vld [vmem:[%s2539_s13] ss:$0 sm:$0xff] }
 0x3d0   : > { %v1164_v25 = vpop.xlane.xlu0 %1163  ;;  %v1169_v42 = vpop.permute.xlu1 %1168 }
 0x3d1   : > { %1927 = vrcp.f32 %v1164_v25  ;;  %v1174_v45 = vsel %vm808_vm5, %v1169_v42, 0 }
 0x3d3   : > { %v1926_v39 = vpop.eup %1925 }
 0x3d4   : > { %v923_v36 = vpop.permute.xlu0 %922  ;;  %v1043_v41 = vmul.f32 %v1926_v39, %v1918_v22  ;;  %v1912_v39 = vld [vmem:[%s2536_s10 + $0x18] sm:$0xff]  }
 0x3d5   : > { %v928_v37 = vsel %vm808_vm5, %v923_v36, 0 }
 0x3d6   : > { %1750 = vmatpush3.bf16.msra.mxu1 %v928_v37  ;;  %v1044_v43 = vpack.c.bf16 %v1043_v41, %v1043_v41 }
 0x3d7   : > { %1761 = vmatprep.subr.bf16.mxu1 %v2081_v0 }
 0x3d9   : > { %1752 = vmatmul.mubr.msk.bf16.vlgmr.msra.gmra.mrb[12].mxu1 %vm741_vm3, %v921_v23  ;;  %v1911_v23 = vld [vmem:[%s2536_s10 + $0x10] sm:$0xff]  }
 0x3da   : > { %1762 = vmatpush3.bf16.msra.mxu1 %v1051_v40  ;;  %1763 = vmatprep.mubr.msk.bf16.mxu1 %vm2082_vm0, %v2081_v0  ;;  %v1663_v40 = vld [vmem:[%s2535_s9] ss:$0 sm:$0xff] }
 0x3db   : > { %1773 = vmatprep.subr.bf16.mxu1 %v2081_v0  ;;  %v1928_v44 = vpop.eup %1927 }
 0x3dc   : > { %v1166_v46 = vmul.f32 %v1928_v44, %v1920_v24 }
 0x3de   : > { %v1167_v47 = vpack.c.bf16 %v1166_v46, %v1166_v46 }
 0x3e1   : > { %1764 = vmatmul.mubr.msk.bf16.vlgmr.msra.gmra.mrb[16].mxu1 %vm741_vm3, %v1044_v43 }
 0x3e2   : > { %1774 = vmatpush3.bf16.msra.mxu1 %v1174_v45  ;;  %1775 = vmatprep.mubr.msk.bf16.mxu1 %vm2082_vm0, %v2081_v0 }
 0x3e3   : > { %1787 = vmatprep.subr.bf16.mxu1 %v2081_v0 }
 0x3e9   : > { %1776 = vmatmul.mubr.msk.bf16.vlgmr.msra.gmra.mrb[20].mxu1 %vm741_vm3, %v1167_v47 }
 0x3ea   : > { %1791 = vmatprep.mubr.msk.bf16.mxu1 %vm2082_vm0, %v2081_v0  ;;  %1788 = vmatpush3.bf16.msra.mxu1 %v1907_v28 }
 0x3eb   : > { %1789 = vmatprep.subr.bf16.mxu1 %v2081_v0 }
 0x3ee   : > { %1790 = vmatpush3.bf16.msra.mxu1 %v1908_v29 }
 0x42e   : > { %v846_v48 = vpop.f32.mrb[8].mxu1 }
 0x42f   : > { %v852_v49 = vpack.c.bf16 %v846_v48, %v846_v48  ;;  %v1741_v50 = vpop.f32.mrb[9].mxu1 }
 0x430   : > { %v849_v51 = vpop.f32.mrb[10].mxu1 }
 0x431   : > { %854 = vst.msk [vmem:[#allocation3] sm:$0xf] %vm853_vm6, %v852_v49  ;;  %v1742_v52 = vpop.f32.mrb[11].mxu1 }
 0x4ac   : > { %v964_v53 = vpop.f32.mrb[12].mxu1 }
 0x4ad   : > { %v1679_v54 = vpack.c.bf16 %v964_v53, %v964_v53  ;;  %v1753_v55 = vpop.f32.mrb[13].mxu1 }
 0x4ae   : > { %v967_v56 = vpop.f32.mrb[14].mxu1 }
 0x4af   : > { %974 = vrot.lane.b32.xlu0 %v1679_v54, %s2090_s30  ;;  %v1754_v57 = vpop.f32.mrb[15].mxu1  ;;  %s1521_s30 = sshll.u32 %s567_s28, 4  ;;  %s2480_s30 = int_to_ptr.vmem [resolvable:$true] %s1521_s30 }
 0x4b0   : > { %s1989_s18 = scalar_lea.vmem %s2480_s30, 128  ;;  %p1996_p2 = scmp.lt.s32.totalorder %s2480_s30, %s1994_s0 }
 0x4b1   : > { %p1990_p13 = scmp.ne.s32.totalorder %s2480_s30, %s1989_s18 }
 0x4b3   : > { %p1991_p10 = pnand %p1990_p13, %p2581_p8 }
 0x4b4   : > { %v1087_v59 = vpop.f32.mrb[16].mxu1 }
 0x4b5   : > { %v1680_v61 = vpack.c.bf16 %v1087_v59, %v1087_v59  ;;  %v1765_v62 = vpop.f32.mrb[17].mxu1  ;;  %p1992_p11 = pneg %p1991_p10 }
 0x4b6   : > { %v1090_v63 = vpop.f32.mrb[18].mxu1 }
 0x4b7   : > { %1097 = vrot.lane.b32.xlu1 %v1680_v61, %s2091_s17  ;;  %v1766_v1 = vpop.f32.mrb[19].mxu1 }
 0x4b8   : > { %v1673_v1 = vld [vmem:[%s2578_s16] ss:$0 sm:$0xff]  ;;  %s1995_s16 = scalar_lea.vmem %s1994_s0, 256 }
 0x4b9   : > { %p1997_p3 = scmp.lt.s32.totalorder %s1995_s16, %s1989_s18 }
 0x4bb   : > { %p1998_p5 = por %p1997_p3, %p1996_p2 }
 0x4bc   : > { %v1210_v2 = vpop.f32.mrb[20].mxu1 }
 0x4bd   : > { %v1681_v4 = vpack.c.bf16 %v1210_v2, %v1210_v2  ;;  %v1777_v5 = vpop.f32.mrb[21].mxu1  ;;  %p1999_p6 = pnand %p1998_p5, %p1992_p11 }
 0x4be   : > { %v1213_v6 = vpop.f32.mrb[22].mxu1 }
 0x4bf   : > { %1220 = vrot.lane.b32.xlu0 %v1681_v4, %s2092_s14  ;;  %v1778_v7 = vpop.f32.mrb[23].mxu1  ;;  %v1674_v4 = vld [vmem:[%s2579_s19] ss:$0 sm:$0xff] }
 0x521   : > { %v975_v8 = vpop.permute.xlu0 %974 }
 0x522   : > { %978 = vst.msk [vmem:[#allocation3] sm:$0xf] %vm977_vm7, %v975_v8 }
 0x529   : > { %v1098_v9 = vpop.permute.xlu1 %1097 }
 0x52a   : > { %1101 = vst.msk [vmem:[#allocation3] sm:$0xf] %vm1100_vm8, %v1098_v9 }
 0x531   : > { %v1221_v10 = vpop.permute.xlu0 %1220 }
 0x532   : > { %1224 = vst.msk [vmem:[#allocation3] sm:$0xf] %vm1223_vm9, %v1221_v10 }
 0x539   : > { %v1225_v11 = vld [vmem:[#allocation3] sm:$0xf] }
 0x53a   : > { %1784 = vmatmul.mubr.msk.bf16.vlgmr.msra.gmra.mrb[16].mxu0 %vm605_vm1, %v1225_v11 }
 0x53b   : > { %1803 = vmatprep.mubr.msk.bf16.mxu0 %vm2082_vm0, %v2081_v0 }
 0x60d   : > { %v1286_v13 = vpop.f32.mrb[16].mxu0 }
 0x60e   : > { %v1287_v14 = vadd.f32 %v1657_v12, %v1286_v13  ;;  %v1785_v15 = vpop.f32.mrb[17].mxu0 }
 0x60f   : > { %v1289_v16 = vpop.f32.mrb[18].mxu0 }
 0x610   : > { %v1786_v17 = vpop.f32.mrb[19].mxu0  ;;  %v1292_v18 = vadd.f32 %v1287_v14, %v2329_v3  ;;  %v1909_v3 = vld [vmem:[%s2536_s10] sm:$0xff]  }
 0x611   : > { %1796 = vmatpush3.bf16.msra.mxu0 %v1909_v3 }
 0x612   : > { %v1295_v19 = vsel %vm605_vm1, %v1292_v18, 0.0  ;;  %1797 = vmatprep.subr.bf16.mxu0 %v2081_v0 }
 0x613   : > { %1296 = vadd.xlane.f32.xlu1 %v1295_v19 }
 0x615   : > { %1798 = vmatpush3.bf16.msra.mxu0 %v1910_v30 }
 0x616   : > { %1799 = vmatprep.subr.bf16.mxu0 %v2081_v0 }
 0x619   : > { %1800 = vmatpush3.bf16.msra.mxu0 %v1911_v23 }
 0x61a   : > { %1801 = vmatprep.subr.bf16.mxu0 %v2081_v0  ;;  %v1667_v0 = vld [vmem:[%s2537_s11] ss:$0 sm:$0xff] }
 0x61d   : > { %1802 = vmatpush3.bf16.msra.mxu0 %v1912_v39 }
 0x6a0   : > { %v1297_v22 = vpop.xlane.xlu1 %1296 }
 0x6a1   : > { %v1299_v20 = vmul.f32 0.03125, %v1297_v22 }
 0x6a3   : > { %v1300_v24 = vsub.f32 %v1292_v18, %v1299_v20 }
 0x6a5   : > { %v1301_v26 = vmul.f32 %v1300_v24, %v1300_v24 }
 0x6a7   : > { %v1302_v27 = vsel %vm605_vm1, %v1301_v26, 0.0 }
 0x6a8   : > { %1303 = vadd.xlane.f32.xlu0 %v1302_v27 }
 0x735   : > { %v1304_v31 = vpop.xlane.xlu0 %1303 }
 0x736   : > { %v1305_v32 = vmul.f32 0.03125, %v1304_v31 }
 0x738   : > { %v1306_v21 = vadd.f32 1e-05, %v1305_v32 }
 0x73a   : > { %1929 = vrsqrt.f32 %v1306_v21 }
 0x744   : > { %v1930_v33 = vpop.eup %1929 }
 0x745   : > { %v1308_v25 = vmul.f32 %v1930_v33, %v1300_v24 }
 0x747   : > { %v1315_v36 = vmul.f32 %v1661_v34, %v1308_v25 }
 0x749   : > { %v1322_v37 = vadd.f32 %v1662_v35, %v1315_v36 }
 0x74b   : > { %v1323_v38 = vpack.c.bf16 %v1322_v37, %v1322_v37 }
 0x74d   : > { %1792 = vmatmul.mubr.msk.bf16.vlgmr.msra.gmra.mrb[24].mxu1 %vm605_vm1, %v1323_v38 }
 0x820   : > { %v1384_v41 = vpop.f32.mrb[24].mxu1 }
 0x821   : > { %v1385_v42 = vadd.f32 %v1663_v40, %v1384_v41  ;;  %v1793_v43 = vpop.f32.mrb[25].mxu1 }
 0x822   : > { %v1387_v44 = vpop.f32.mrb[26].mxu1 }
 0x823   : > { %v1390_v45 = vmax.f32 %v1385_v42, 0.0  ;;  %v1794_v46 = vpop.f32.mrb[27].mxu1 }
 0x825   : > { %v1391_v47 = vpack.c.bf16 %v1390_v45, %v1390_v45 }
 0x827   : > { %1804 = vmatmul.mubr.msk.bf16.vlgmr.msra.gmra.mrb[20].mxu0 %vm1431_vm10, %v1391_v47 }
 0x8fa   : > { %v1469_v48 = vpop.f32.mrb[20].mxu0 }
 0x8fb   : > { %v1470_v49 = vadd.f32 %v1667_v0, %v1469_v48  ;;  %v1805_v50 = vpop.f32.mrb[21].mxu0 }
 0x8fc   : > { %v1472_v51 = vpop.f32.mrb[22].mxu0 }
 0x8fd   : > { %v1806_v52 = vpop.f32.mrb[23].mxu0  ;;  %v1475_v53 = vadd.f32 %v1470_v49, %v1322_v37 }
 0x8ff   : > { %v1478_v54 = vsel %vm605_vm1, %v1475_v53, 0.0 }
 0x900   : > { %1479 = vadd.xlane.f32.xlu0 %v1478_v54 }
 0x98d   : > { %v1480_v55 = vpop.xlane.xlu0 %1479 }
 0x98e   : > { %v1481_v56 = vmul.f32 0.03125, %v1480_v55 }
 0x990   : > { %v1482_v57 = vsub.f32 %v1475_v53, %v1481_v56 }
 0x992   : > { %v1483_v58 = vmul.f32 %v1482_v57, %v1482_v57 }
 0x994   : > { %v1484_v59 = vsel %vm605_vm1, %v1483_v58, 0.0 }
 0x995   : > { %1485 = vadd.xlane.f32.xlu1 %v1484_v59 }
 0xa22   : > { %v1486_v60 = vpop.xlane.xlu1 %1485 }
 0xa23   : > { %v1487_v61 = vmul.f32 0.03125, %v1486_v60 }
 0xa25   : > { %v1488_v62 = vadd.f32 1e-05, %v1487_v61 }
 0xa27   : > { %1931 = vrsqrt.f32 %v1488_v62 }
 0xa31   : > { %v1932_v63 = vpop.eup %1931 }
 0xa32   : > { %v1490_v2 = vmul.f32 %v1932_v63, %v1482_v57 }
 0xa34   : > { %v1497_v5 = vmul.f32 %v1673_v1, %v1490_v2 }
 0xa36   : > { %v1504_v6 = vadd.f32 %v1674_v4, %v1497_v5 }
 0xa38   : > { %1505 = vst.msk [vmem:[%s567_s28] sm:$0xff] %vm605_vm1, %v1504_v6 }
 0xa39   : > { %2002 = shalt.err (!%p1999_p6)
}
 0xa3a   : > { %s2003_s29 = scalar_lea.hbm %s2478_s21, 128  ;;  %s2007_s19 = scalar_lea.hbm %s2580_s15, 256 }
 0xa3b   : > { %p2004_p7 = scmp.ne.s32.totalorder %s2478_s21, %s2003_s29  ;;  %p2008_p0 = scmp.lt.u32.totalorder %s2478_s21, %s2580_s15 }
 0xa3c   : > { %p2009_p4 = scmp.lt.u32.totalorder %s2007_s19, %s2003_s29  ;;  %p2011_p13 = scmp.lt.u32.totalorder %s2003_s29, %s2478_s21 }
 0xa3d   : > { %p2005_p9 = pnand %p2004_p7, %p2581_p8 }
 0xa3e   : > { %p2010_p1 = por %p2009_p4, %p2008_p0 }
 0xa3f   : > { %p2006_p12 = pneg %p2005_p9 }
 0xa40   : > { %p2012_p10 = por %p2011_p13, %p2010_p1 }
 0xa42   : > { %p2013_p11 = pnand %p2012_p10, %p2006_p12 }
 0xa44   : > { %2016 = shalt.err (!%p2013_p11)
}
 0xa45   : > { %1815 = dma.vmem_to_hbm [thread:$0]  (%p2581_p8), %s2480_s30, 128, %s2478_s21, %s1507_s26  }
 0xa46 PF: > { %s2582_s17 = sld [smem:[#allocation16_spill]]  ;;  %s2583_s14 = sld [smem:[#allocation13_spill]] }
 0xa47   : > { %s2584_s18 = sld [smem:[#allocation19_spill]] }
 0xa4c   : > { %p1832_p2 = scmp.ge.s32.totalorder %s2582_s17, 2  ;;  %s1533_s24 = sand.u32 1, %s2583_s14  }
 0xa4d   : > { %p2585_p3 = scmp.ne.s32.totalorder %s2584_s18, 0  ;;  %s1534_s0 = scalar_lea.sflag [#allocation6], %s1533_s24 }
 0xa4f   : > { %p1825_p5 = pnand %p1832_p2, %p2585_p3 }
 0xa51   : > { %2050 = dma.done.wait (!%p1825_p5), %s1534_s0, 128  }
 0xa52   : > { %2052 = vsyncadd (!%p1825_p5), %s1534_s0, 4294967168  ;;  %s31_s26 = sadd.s32 1, %s2582_s17   ;;  %s2586_s16 = sld [smem:[#allocation14_spill]] }
 0xa53   : > { %p28_p6 = scmp.ge.s32.totalorder %s31_s26, 4   ;;  %s2587_s23 = sld [smem:[#allocation20_spill]] }
 0xa54   : > { %s2588_s24 = sld [smem:[#allocation15_spill]]  ;;  %s2589_s25 = sld [smem:[#allocation17_spill]] }
 0xa55   : > { %s2590_s21 = smov %s2059_s22  ;;  %30 = sbr.rel (!%p28_p6) target bundleno = 11 (0xb), region = 136 }
 0xa58   : > { %s2591_s22 = smov %s2586_s16 }
 0xa5c   :  { %1539 = vsyncpa [#allocation5], 1 }
 0xa5d   :  { %1541 = vsyncpa [#allocation5 + $0x1], 1 }
 0xa5e   :  { %1542 = vsyncpa [#allocation8], 1 }
 0xa5f   :  { %1543 = vsyncpa [#allocation6], 1 }
 0xa60   :  { %1545 = vsyncpa [#allocation6 + $0x1], 1 }

</bundles_post_ra>
